<compile_context>
chip_gen: v5e
topology: v5e:2x2
jax: 0.10.0
libtpu: 0.0.40
codegen_flags: <defaults>
</compile_context>

<pallas_src>
import functools

import jax
import jax.numpy as jnp
from jax.experimental import pallas as pl
from jax.experimental.pallas import tpu as pltpu


# ----------------------- box-coordinate helpers (plain JAX glue) -----------------

def cxcy_to_xy(cxcy):
    return jnp.concatenate(
        [cxcy[:, :2] - cxcy[:, 2:] / 2.0, cxcy[:, :2] + cxcy[:, 2:] / 2.0], axis=1)


def _pick_batch_tile(B, max_tile=8):
    """Largest divisor of B <= max_tile that still leaves >= 2 grid steps
    (keeps the 'parallel' batch axis shardable across v7x's two TensorCores)."""
    best = 1
    for t in range(1, min(B, max_tile) + 1):
        if B % t == 0 and (B // t >= 2 or B == 1):
            best = t
    return best


# ------------- Pallas kernel 1: fused Jaccard (IoU) overlap + matching -----------

def _iou_match_kernel(boxes_ref, priors_ref, ov_ref, obj_ref, bov_ref, bidx_ref):
    # boxes_ref:  (BT, n_obj, 4)        GT boxes (xy) for BT images
    # priors_ref: (5, PT)               prior x0,y0,x1,y1,area — lane-dense, area hoisted
    # ov_ref:     (BT, 1, PT)  f32      max IoU over objects, per prior
    # obj_ref:    (BT, 1, PT)  int32    argmax object per prior (first occurrence)
    # bov_ref:    (BT, n_obj, 128) f32  running max IoU per object (lane-replicated)
    # bidx_ref:   (BT, n_obj, 128) i32  running argmax prior per object
    p = pl.program_id(1)
    PT = priors_ref.shape[1]

    bxs = boxes_ref[...]                                 # (BT, n_obj, 4)
    bx0 = bxs[:, :, 0:1]
    by0 = bxs[:, :, 1:2]
    bx1 = bxs[:, :, 2:3]
    by1 = bxs[:, :, 3:4]                                 # (BT, n_obj, 1)
    pri = priors_ref[...]
    px0 = pri[0:1, :][None]                              # (1, 1, PT)
    py0 = pri[1:2, :][None]
    px1 = pri[2:3, :][None]
    py1 = pri[3:4, :][None]
    area_p = pri[4:5, :][None]                           # precomputed in wrapper

    iw = jnp.maximum(jnp.minimum(bx1, px1) - jnp.maximum(bx0, px0), 0.0)
    ih = jnp.maximum(jnp.minimum(by1, py1) - jnp.maximum(by0, py0), 0.0)
    inter = iw * ih                                      # (BT, n_obj, PT)
    area_b = (bx1 - bx0) * (by1 - by0)                   # (BT, n_obj, 1)
    union = area_b + area_p - inter
    # exact division (approx reciprocal can flip matches at the 0.5 threshold);
    # like the PyTorch reference, degenerate zero-area boxes still give inf/NaN.
    iou = inter / union                                  # (BT, n_obj, PT)

    big = jnp.int32(2 ** 30)

    # ---- per-prior best object: max + first-occurrence argmax over objects ----
    ov_max = jnp.max(iou, axis=1, keepdims=True)                       # (BT,1,PT)
    obj_iota = jax.lax.broadcasted_iota(jnp.int32, iou.shape, 1)
    obj_arg = jnp.min(jnp.where(iou == ov_max, obj_iota, big),
                      axis=1, keepdims=True)                           # (BT,1,PT)
    ov_ref[...] = ov_max
    obj_ref[...] = obj_arg

    # ---- per-object best prior: running max/argmax across prior tiles ----
    t_max = jnp.max(iou, axis=2, keepdims=True)                        # (BT,n_obj,1)
    pr_iota = jax.lax.broadcasted_iota(jnp.int32, iou.shape, 2)
    t_arg = jnp.min(jnp.where(iou == t_max, pr_iota, big),
                    axis=2, keepdims=True) + p * PT                    # (BT,n_obj,1)

    @pl.when(p == 0)
    def _():
        bov_ref[...] = jnp.full(bov_ref.shape, -1.0, bov_ref.dtype)
        bidx_ref[...] = jnp.zeros(bidx_ref.shape, bidx_ref.dtype)

    prev_ov = bov_ref[...]                                             # (BT,n_obj,128)
    prev_idx = bidx_ref[...]
    take = t_max > prev_ov            # strict '>' keeps the earlier-tile tie (== argmax)
    bov_ref[...] = jnp.where(take, t_max, prev_ov)       # lane-dense (unmasked) store
    bidx_ref[...] = jnp.where(take, t_arg, prev_idx)


def jaccard_match(boxes_xy, priors_xy, prior_tile, batch_tile):
    B, n_obj, _ = boxes_xy.shape
    P = priors_xy.shape[0]
    area = (priors_xy[:, 2] - priors_xy[:, 0]) * (priors_xy[:, 3] - priors_xy[:, 1])
    priors5 = jnp.concatenate([priors_xy.T, area[None, :]], axis=0)    # (5, P)

    ov, obj, _bov, bidx = pl.pallas_call(
        _iou_match_kernel,
        out_shape=(
            jax.ShapeDtypeStruct((B, 1, P), jnp.float32),      # max IoU per prior
            jax.ShapeDtypeStruct((B, 1, P), jnp.int32),        # argmax object per prior
            jax.ShapeDtypeStruct((B, n_obj, 128), jnp.float32),
            jax.ShapeDtypeStruct((B, n_obj, 128), jnp.int32),  # argmax prior per object
        ),
        grid_spec=pltpu.PrefetchScalarGridSpec(
            num_scalar_prefetch=0,
            grid=(B // batch_tile, P // prior_tile),
            in_specs=[
                pl.BlockSpec((batch_tile, n_obj, 4), lambda b, p: (b, 0, 0)),
                pl.BlockSpec((5, prior_tile), lambda b, p: (0, p)),
            ],
            out_specs=[
                pl.BlockSpec((batch_tile, 1, prior_tile), lambda b, p: (b, 0, p)),
                pl.BlockSpec((batch_tile, 1, prior_tile), lambda b, p: (b, 0, p)),
                pl.BlockSpec((batch_tile, n_obj, 128), lambda b, p: (b, 0, 0)),
                pl.BlockSpec((batch_tile, n_obj, 128), lambda b, p: (b, 0, 0)),
            ],
        ),
        compiler_params=pltpu.CompilerParams(
            dimension_semantics=("parallel", "arbitrary"),
            vmem_limit_bytes=48 * 1024 * 1024),
    )(boxes_xy, priors5)
    best_prior = bidx[:, :, 0:1]           # (B, n_obj, 1): lane 0 of replicated block
    return ov, obj, best_prior


# ----- Pallas kernel 2: fused match-override + encode + CE + L1 + hard-neg mining -----

def _fused_loss_kernel(scores_ref, plocs_ref, ov_ref, obj_ref, bp_ref,
                       boxes_ref, labels_ref, pcxcy_ref, sums_ref, *,
                       threshold, neg_pos_ratio, bisect_iters):
    # scores_ref: (BT, C, P)     predicted class scores, prior axis lane-dense
    # plocs_ref:  (BT, 4, P)     predicted loc offsets
    # ov_ref:     (BT, 1, P)     max IoU per prior         (kernel 1)
    # obj_ref:    (BT, 1, P)     argmax object per prior   (kernel 1)
    # bp_ref:     (BT, n_obj, 1) best prior per object     (kernel 1)
    # boxes_ref:  (BT, n_obj, 4) GT boxes (xy)
    # labels_ref: (BT, n_obj, 1) GT labels (int32)
    # pcxcy_ref:  (4, P)         priors in cxcy, lane-dense
    # sums_ref:   (BT, 1, 128)   lane 0: sum|dloc| pos, 1: n_pos, 2: sum CE pos,
    #                            lane 3: hard-negative CE sum
    f32 = jnp.float32
    BT, C, P = scores_ref.shape
    n_obj = boxes_ref.shape[1]

    # ---- matching: best-prior override (PyTorch: last object wins on shared prior) ----
    prior_iota = jax.lax.broadcasted_iota(jnp.int32, (BT, n_obj, P), 2)
    obj_iota = jax.lax.broadcasted_iota(jnp.int32, (BT, n_obj, P), 1)
    is_best = prior_iota == bp_ref[...]                          # (BT, n_obj, P)
    ovr = jnp.max(jnp.where(is_best, obj_iota, -1), axis=1, keepdims=True)
    obj = jnp.where(ovr >= 0, ovr, obj_ref[...])                 # (BT, 1, P)
    ov = jnp.where(ovr >= 0, 1.0, ov_ref[...])                   # (BT, 1, P)

    # ---- per-prior label / matched box via one-hot select over the object axis ----
    match = obj == obj_iota                                      # (BT, n_obj, P)
    label_pp = jnp.sum(jnp.where(match, labels_ref[...], 0),
                       axis=1, keepdims=True)                    # (BT, 1, P) int32
    cls_tgt = jnp.where(ov < threshold, 0, label_pp)             # background override
    posf = (cls_tgt != 0).astype(f32)                            # (BT, 1, P)

    eq = match.astype(f32)
    bxs = boxes_ref[...]
    mx0 = jnp.sum(eq * bxs[:, :, 0:1], axis=1, keepdims=True)    # matched box coords
    my0 = jnp.sum(eq * bxs[:, :, 1:2], axis=1, keepdims=True)
    mx1 = jnp.sum(eq * bxs[:, :, 2:3], axis=1, keepdims=True)
    my1 = jnp.sum(eq * bxs[:, :, 3:4], axis=1, keepdims=True)

    # xy -> cxcy -> gcxgcy encoding against the priors (all lane-dense)
    pc = pcxcy_ref[...]
    pcx = pc[0:1, :][None]
    pcy = pc[1:2, :][None]
    pw = pc[2:3, :][None]
    ph = pc[3:4, :][None]
    mcx = (mx0 + mx1) * 0.5
    mcy = (my0 + my1) * 0.5
    mw = mx1 - mx0
    mh = my1 - my0
    t_gcx = (mcx - pcx) / (pw * 0.1)
    t_gcy = (mcy - pcy) / (ph * 0.1)
    t_gw = jnp.log(mw / pw) * 5.0
    t_gh = jnp.log(mh / ph) * 5.0

    # ---- localization: L1 over positive priors (sum; mean taken outside) ----
    plocs = plocs_ref[...].astype(f32)                           # (BT, 4, P)
    l1 = (jnp.abs(plocs[:, 0:1, :] - t_gcx) + jnp.abs(plocs[:, 1:2, :] - t_gcy)
          + jnp.abs(plocs[:, 2:3, :] - t_gw) + jnp.abs(plocs[:, 3:4, :] - t_gh))
    l1 = jnp.where(posf > 0.0, l1, 0.0)        # where (not *): avoids NaN poisoning
    loc_s = jnp.sum(l1, axis=2, keepdims=True)                   # (BT, 1, 1)

    # ---- per-prior cross entropy (class axis on sublanes, exp/log on the EUP) ----
    scores = scores_ref[...].astype(f32)                         # bf16 inputs ok
    m = jnp.max(scores, axis=1, keepdims=True)
    lse = m + jnp.log(jnp.sum(jnp.exp(scores - m), axis=1, keepdims=True))
    cls_iota = jax.lax.broadcasted_iota(jnp.int32, (BT, C, P), 1)
    tgt = jnp.sum(jnp.where(cls_iota == cls_tgt, scores, 0.0), axis=1, keepdims=True)
    ce = lse - tgt                                               # (BT, 1, P)

    n_pos = jnp.sum(posf, axis=2, keepdims=True)                 # (BT, 1, 1)
    ce_pos = jnp.sum(jnp.where(posf > 0.0, ce, 0.0), axis=2, keepdims=True)

    # ---- hard-negative mining: exact sum of the top-K negative CEs, K = ratio*n_pos ----
    # Bit-pattern bisection (non-negative f32 orders like its int32 bits); replaces the
    # O(P log^2 P) XLA sort and keeps the per-prior CE entirely in VMEM.
    conf_neg = jnp.where(posf > 0.0, 0.0, jnp.maximum(ce, 0.0))  # >= 0, positives masked
    bits = pltpu.bitcast(conf_neg, jnp.int32)                    # (BT, 1, P)
    k_eff = jnp.minimum(neg_pos_ratio * n_pos, jnp.float32(P))   # (BT, 1, 1)
    lo0 = jnp.zeros((BT, 1, 1), jnp.int32)
    hi0 = jnp.max(bits, axis=2, keepdims=True) + 1

    def body(_, carry):
        lo, hi = carry
        mid = lo + (hi - lo) // 2
        cnt = jnp.sum((bits >= mid).astype(f32), axis=2, keepdims=True)
        up = cnt >= k_eff
        return jnp.where(up, mid, lo), jnp.where(up, hi, mid)

    lo, _hi = jax.lax.fori_loop(0, bisect_iters, body, (lo0, hi0))
    # K-th largest value = largest array value whose bits <= lo (exact, handles ties)
    kth = jnp.max(jnp.where(bits <= lo, conf_neg, 0.0), axis=2, keepdims=True)
    above = bits > lo
    cnt_above = jnp.sum(above.astype(f32), axis=2, keepdims=True)
    sum_above = jnp.sum(jnp.where(above, conf_neg, 0.0), axis=2, keepdims=True)
    hard_neg = sum_above + jnp.maximum(k_eff - cnt_above, 0.0) * kth   # (BT, 1, 1)

    # ---- one consolidated lane-dense store per batch tile ----
    lane = jax.lax.broadcasted_iota(jnp.int32, (BT, 1, 128), 2)
    sums_ref[...] = (jnp.where(lane == 0, loc_s, 0.0)
                     + jnp.where(lane == 1, n_pos, 0.0)
                     + jnp.where(lane == 2, ce_pos, 0.0)
                     + jnp.where(lane == 3, hard_neg, 0.0))


def fused_loss_partials(pred_scores, pred_locs, ov_pp, obj_pp, best_prior,
                        boxes_xy, labels, priors_cxcy, threshold, neg_pos_ratio,
                        batch_tile):
    B, P, C = pred_scores.shape
    n_obj = boxes_xy.shape[1]

    # Layout plumbing: prior axis lane-dense in-kernel.
    # TODO(synk): have the detection head emit (B, C, P)/(B, 4, P) (and/or bf16)
    #             directly so these full-pass HBM transposes disappear (v5e/v6e
    #             are bandwidth-bound in this kernel).
    scores_t = jnp.transpose(pred_scores, (0, 2, 1))             # (B, C, P)
    plocs_t = jnp.transpose(pred_locs, (0, 2, 1))                # (B, 4, P)
    pcxcy_t = priors_cxcy.T                                      # (4, P)
    labels3 = labels.astype(jnp.int32)[:, :, None]               # (B, n_obj, 1)

    kern = functools.partial(_fused_loss_kernel, threshold=float(threshold),
                             neg_pos_ratio=float(neg_pos_ratio), bisect_iters=32)
    sums = pl.pallas_call(
        kern,
        out_shape=jax.ShapeDtypeStruct((B, 1, 128), jnp.float32),
        grid_spec=pltpu.PrefetchScalarGridSpec(
            num_scalar_prefetch=0,
            grid=(B // batch_tile,),
            in_specs=[
                pl.BlockSpec((batch_tile, C, P), lambda g: (g, 0, 0)),
                pl.BlockSpec((batch_tile, 4, P), lambda g: (g, 0, 0)),
                pl.BlockSpec((batch_tile, 1, P), lambda g: (g, 0, 0)),
                pl.BlockSpec((batch_tile, 1, P), lambda g: (g, 0, 0)),
                pl.BlockSpec((batch_tile, n_obj, 1), lambda g: (g, 0, 0)),
                pl.BlockSpec((batch_tile, n_obj, 4), lambda g: (g, 0, 0)),
                pl.BlockSpec((batch_tile, n_obj, 1), lambda g: (g, 0, 0)),
                pl.BlockSpec((4, P), lambda g: (0, 0)),
            ],
            out_specs=pl.BlockSpec((batch_tile, 1, 128), lambda g: (g, 0, 0)),
        ),
        compiler_params=pltpu.CompilerParams(
            dimension_semantics=("parallel",),
            vmem_limit_bytes=48 * 1024 * 1024),
    )(scores_t, plocs_t, ov_pp, obj_pp, best_prior, boxes_xy, labels3, pcxcy_t)

    sums = sums[:, 0, :]                                         # (B, 128)
    return sums[:, 0], sums[:, 1], sums[:, 2], sums[:, 3]


# --------------------------- full MultiBoxLoss forward ---------------------------

def multibox_loss(pred_locs, pred_scores, boxes_xy, labels, priors_cxcy,
                  threshold=0.5, neg_pos_ratio=3, alpha=1.0,
                  prior_tile=None, batch_tile=None):
    # boxes_xy: (B, n_obj, 4) — fixed number of GT boxes per image
    # TODO(synk): PyTorch takes a per-image *list* of variable-length box tensors;
    #             here n_objects is fixed per image (synthetic data / padding).
    B, P, _ = pred_locs.shape
    if batch_tile is None:
        batch_tile = _pick_batch_tile(B)
    if prior_tile is None or P % prior_tile != 0:
        prior_tile = P          # kernel 2 mines hard negatives over the full prior axis
    priors_xy = cxcy_to_xy(priors_cxcy)

    # hot path 1: fused IoU + matching reductions (Pallas)
    ov_pp, obj_pp, best_prior = jaccard_match(boxes_xy, priors_xy,
                                              prior_tile, batch_tile)

    # hot path 2: fused match-override + encode + CE + L1 + hard-neg mining (Pallas)
    loc_sum, n_pos, ce_pos_sum, hard_neg_sum = fused_loss_partials(
        pred_scores, pred_locs, ov_pp, obj_pp, best_prior, boxes_xy, labels,
        priors_cxcy, threshold, neg_pos_ratio, batch_tile)

    n_pos_total = jnp.sum(n_pos)
    denom = jnp.maximum(n_pos_total, 1.0)       # guard: batch with zero positives
    conf_loss = (jnp.sum(hard_neg_sum) + jnp.sum(ce_pos_sum)) / denom
    loc_loss = jnp.sum(loc_sum) / (denom * 4.0)  # nn.L1Loss (mean over pos x 4 coords)
    return conf_loss + alpha * loc_loss


if __name__ == "__main__":
    key = jax.random.PRNGKey(0)
    B, n_obj, C = 2, 3, 8
    fm = 16
    P = fm * fm                                                  # 256 priors

    # deterministic prior grid (cx, cy, w, h) in [0, 1]
    xs = (jnp.arange(fm, dtype=jnp.float32) + 0.5) / fm
    cy, cx = jnp.meshgrid(xs, xs, indexing="ij")
    priors_cxcy = jnp.stack(
        [cx.ravel(), cy.ravel(),
         jnp.full((P,), 0.15, jnp.float32), jnp.full((P,), 0.15, jnp.float32)],
        axis=1)

    k1, k2, k3, k4, k5 = jax.random.split(key, 5)
    pred_locs = jax.random.normal(k1, (B, P, 4), jnp.float32)
    pred_scores = jax.random.normal(k2, (B, P, C), jnp.float32)

    centers = jax.random.uniform(k3, (B, n_obj, 2), minval=0.25, maxval=0.75)
    sizes = jax.random.uniform(k4, (B, n_obj, 2), minval=0.1, maxval=0.4)
    boxes_xy = jnp.concatenate([centers - sizes / 2, centers + sizes / 2], axis=-1)
    labels = jax.random.randint(k5, (B, n_obj), 1, C)            # nonzero classes

    loss = multibox_loss(pred_locs, pred_scores, boxes_xy, labels, priors_cxcy)
    jax.block_until_ready(loss)
    print("KERNEL_OK")
</pallas_src>

<mosaic_0001>
module attributes {stable_mosaic.version = 11 : i64} {
  func.func @_iou_match_kernel(%arg0: i32, %arg1: i32, %arg2: memref<1x3x4xf32, #tpu.memory_space<vmem>>, %arg3: memref<5x256xf32, #tpu.memory_space<vmem>>, %arg4: memref<1x1x256xf32, #tpu.memory_space<vmem>>, %arg5: memref<1x1x256xi32, #tpu.memory_space<vmem>>, %arg6: memref<1x3x128xf32, #tpu.memory_space<vmem>>, %arg7: memref<1x3x128xi32, #tpu.memory_space<vmem>>) attributes {dimension_semantics = [#tpu.dimension_semantics<parallel>, #tpu.dimension_semantics<arbitrary>], iteration_bounds = array<i64: 2, 1>, scalar_prefetch = 0 : i64, scratch_operands = 0 : i64, tpu.core_type = #tpu.core_type<tc>, window_params = [{transform_indices = @transform_0, window_bounds = array<i64: 1, 3, 4>}, {transform_indices = @transform_1, window_bounds = array<i64: 5, 256>}, {transform_indices = @transform_2, window_bounds = array<i64: 1, 1, 256>}, {transform_indices = @transform_3, window_bounds = array<i64: 1, 1, 256>}, {transform_indices = @transform_4, window_bounds = array<i64: 1, 3, 128>}, {transform_indices = @transform_5, window_bounds = array<i64: 1, 3, 128>}]} {
    %c0 = arith.constant 0 : index
    %c0_0 = arith.constant 0 : index
    %c0_1 = arith.constant 0 : index
    %0 = vector.load %arg2[%c0, %c0_0, %c0_1] : memref<1x3x4xf32, #tpu.memory_space<vmem>>, vector<1x3x4xf32>
    %1 = vector.extract_strided_slice %0 {offsets = [0, 0, 0], sizes = [1, 3, 1], strides = [1, 1, 1]} : vector<1x3x4xf32> to vector<1x3x1xf32>
    %2 = vector.extract_strided_slice %0 {offsets = [0, 0, 1], sizes = [1, 3, 1], strides = [1, 1, 1]} : vector<1x3x4xf32> to vector<1x3x1xf32>
    %3 = vector.extract_strided_slice %0 {offsets = [0, 0, 2], sizes = [1, 3, 1], strides = [1, 1, 1]} : vector<1x3x4xf32> to vector<1x3x1xf32>
    %4 = vector.extract_strided_slice %0 {offsets = [0, 0, 3], sizes = [1, 3, 1], strides = [1, 1, 1]} : vector<1x3x4xf32> to vector<1x3x1xf32>
    %c0_2 = arith.constant 0 : index
    %c0_3 = arith.constant 0 : index
    %5 = vector.load %arg3[%c0_2, %c0_3] : memref<5x256xf32, #tpu.memory_space<vmem>>, vector<5x256xf32>
    %6 = vector.extract_strided_slice %5 {offsets = [0, 0], sizes = [1, 256], strides = [1, 1]} : vector<5x256xf32> to vector<1x256xf32>
    %7 = vector.shape_cast %6 : vector<1x256xf32> to vector<1x1x256xf32>
    %8 = vector.extract_strided_slice %5 {offsets = [1, 0], sizes = [1, 256], strides = [1, 1]} : vector<5x256xf32> to vector<1x256xf32>
    %9 = vector.shape_cast %8 : vector<1x256xf32> to vector<1x1x256xf32>
    %10 = vector.extract_strided_slice %5 {offsets = [2, 0], sizes = [1, 256], strides = [1, 1]} : vector<5x256xf32> to vector<1x256xf32>
    %11 = vector.shape_cast %10 : vector<1x256xf32> to vector<1x1x256xf32>
    %12 = vector.extract_strided_slice %5 {offsets = [3, 0], sizes = [1, 256], strides = [1, 1]} : vector<5x256xf32> to vector<1x256xf32>
    %13 = vector.shape_cast %12 : vector<1x256xf32> to vector<1x1x256xf32>
    %14 = vector.extract_strided_slice %5 {offsets = [4, 0], sizes = [1, 256], strides = [1, 1]} : vector<5x256xf32> to vector<1x256xf32>
    %15 = vector.shape_cast %14 : vector<1x256xf32> to vector<1x1x256xf32>
    %16 = vector.broadcast %3 : vector<1x3x1xf32> to vector<1x3x256xf32>
    %17 = vector.broadcast %11 : vector<1x1x256xf32> to vector<1x3x256xf32>
    %18 = arith.minimumf %16, %17 : vector<1x3x256xf32>
    %19 = vector.broadcast %1 : vector<1x3x1xf32> to vector<1x3x256xf32>
    %20 = vector.broadcast %7 : vector<1x1x256xf32> to vector<1x3x256xf32>
    %21 = arith.maximumf %19, %20 : vector<1x3x256xf32>
    %22 = arith.subf %18, %21 : vector<1x3x256xf32>
    %cst = arith.constant 0.000000e+00 : f32
    %23 = vector.broadcast %cst : f32 to vector<1x3x256xf32>
    %24 = arith.maximumf %22, %23 : vector<1x3x256xf32>
    %25 = vector.broadcast %4 : vector<1x3x1xf32> to vector<1x3x256xf32>
    %26 = vector.broadcast %13 : vector<1x1x256xf32> to vector<1x3x256xf32>
    %27 = arith.minimumf %25, %26 : vector<1x3x256xf32>
    %28 = vector.broadcast %2 : vector<1x3x1xf32> to vector<1x3x256xf32>
    %29 = vector.broadcast %9 : vector<1x1x256xf32> to vector<1x3x256xf32>
    %30 = arith.maximumf %28, %29 : vector<1x3x256xf32>
    %31 = arith.subf %27, %30 : vector<1x3x256xf32>
    %cst_4 = arith.constant 0.000000e+00 : f32
    %32 = vector.broadcast %cst_4 : f32 to vector<1x3x256xf32>
    %33 = arith.maximumf %31, %32 : vector<1x3x256xf32>
    %34 = arith.mulf %24, %33 : vector<1x3x256xf32>
    %35 = arith.subf %3, %1 : vector<1x3x1xf32>
    %36 = arith.subf %4, %2 : vector<1x3x1xf32>
    %37 = arith.mulf %35, %36 : vector<1x3x1xf32>
    %38 = vector.broadcast %37 : vector<1x3x1xf32> to vector<1x3x256xf32>
    %39 = vector.broadcast %15 : vector<1x1x256xf32> to vector<1x3x256xf32>
    %40 = arith.addf %38, %39 : vector<1x3x256xf32>
    %41 = arith.subf %40, %34 : vector<1x3x256xf32>
    %42 = arith.divf %34, %41 : vector<1x3x256xf32>
    %cst_5 = arith.constant dense<0xFF800000> : vector<1x256xf32>
    %43 = vector.multi_reduction <maximumf>, %42, %cst_5 [1] : vector<1x3x256xf32> to vector<1x256xf32>
    %44 = vector.shape_cast %43 : vector<1x256xf32> to vector<1x1x256xf32>
    %45 = tpu.iota {dimensions = array<i32: 1>} : vector<1x3x256xi32>
    %46 = vector.broadcast %44 : vector<1x1x256xf32> to vector<1x3x256xf32>
    %47 = arith.cmpf oeq, %42, %46 : vector<1x3x256xf32>
    %c1073741824_i32 = arith.constant 1073741824 : i32
    %48 = vector.broadcast %c1073741824_i32 : i32 to vector<1x3x256xi32>
    %49 = arith.select %47, %45, %48 : vector<1x3x256xi1>, vector<1x3x256xi32>
    %cst_6 = arith.constant dense<2147483647> : vector<1x256xi32>
    %50 = vector.multi_reduction <minsi>, %49, %cst_6 [1] : vector<1x3x256xi32> to vector<1x256xi32>
    %51 = vector.shape_cast %50 : vector<1x256xi32> to vector<1x1x256xi32>
    %c0_7 = arith.constant 0 : index
    %c0_8 = arith.constant 0 : index
    %c0_9 = arith.constant 0 : index
    %52 = vector.load %arg4[%c0_7, %c0_8, %c0_9] : memref<1x1x256xf32, #tpu.memory_space<vmem>>, vector<1x1x256xf32>
    tpu.vector_store %arg4[%c0_7, %c0_8, %c0_9], %44 {strides = array<i32>} : memref<1x1x256xf32, #tpu.memory_space<vmem>>, vector<1x1x256xf32>,
    %c0_10 = arith.constant 0 : index
    %c0_11 = arith.constant 0 : index
    %c0_12 = arith.constant 0 : index
    %53 = vector.load %arg5[%c0_10, %c0_11, %c0_12] : memref<1x1x256xi32, #tpu.memory_space<vmem>>, vector<1x1x256xi32>
    tpu.vector_store %arg5[%c0_10, %c0_11, %c0_12], %51 {strides = array<i32>} : memref<1x1x256xi32, #tpu.memory_space<vmem>>, vector<1x1x256xi32>,
    %cst_13 = arith.constant dense<0xFF800000> : vector<1x3xf32>
    %54 = vector.multi_reduction <maximumf>, %42, %cst_13 [2] : vector<1x3x256xf32> to vector<1x3xf32>
    %55 = vector.shape_cast %54 : vector<1x3xf32> to vector<1x3x1xf32>
    %56 = tpu.iota {dimensions = array<i32: 2>} : vector<1x3x256xi32>
    %57 = vector.broadcast %55 : vector<1x3x1xf32> to vector<1x3x256xf32>
    %58 = arith.cmpf oeq, %42, %57 : vector<1x3x256xf32>
    %c1073741824_i32_14 = arith.constant 1073741824 : i32
    %59 = vector.broadcast %c1073741824_i32_14 : i32 to vector<1x3x256xi32>
    %60 = arith.select %58, %56, %59 : vector<1x3x256xi1>, vector<1x3x256xi32>
    %cst_15 = arith.constant dense<2147483647> : vector<1x3xi32>
    %61 = vector.multi_reduction <minsi>, %60, %cst_15 [2] : vector<1x3x256xi32> to vector<1x3xi32>
    %62 = vector.shape_cast %61 : vector<1x3xi32> to vector<1x3x1xi32>
    %c256_i32 = arith.constant 256 : i32
    %63 = arith.muli %arg1, %c256_i32 : i32
    %64 = vector.broadcast %63 : i32 to vector<1x3x1xi32>
    %65 = arith.addi %62, %64 : vector<1x3x1xi32>
    %c0_i32 = arith.constant 0 : i32
    %66 = arith.cmpi eq, %arg1, %c0_i32 : i32
    %67 = arith.extui %66 : i1 to i32
    %c0_i32_16 = arith.constant 0 : i32
    %68 = arith.cmpi ne, %67, %c0_i32_16 : i32
    scf.if %68 {
      %cst_29 = arith.constant -1.000000e+00 : f32
      %81 = vector.broadcast %cst_29 : f32 to vector<1x3x128xf32>
      %c0_30 = arith.constant 0 : index
      %c0_31 = arith.constant 0 : index
      %c0_32 = arith.constant 0 : index
      %82 = vector.load %arg6[%c0_30, %c0_31, %c0_32] : memref<1x3x128xf32, #tpu.memory_space<vmem>>, vector<1x3x128xf32>
      tpu.vector_store %arg6[%c0_30, %c0_31, %c0_32], %81 {strides = array<i32>} : memref<1x3x128xf32, #tpu.memory_space<vmem>>, vector<1x3x128xf32>,
      %c0_i32_33 = arith.constant 0 : i32
      %83 = vector.broadcast %c0_i32_33 : i32 to vector<1x3x128xi32>
      %c0_34 = arith.constant 0 : index
      %c0_35 = arith.constant 0 : index
      %c0_36 = arith.constant 0 : index
      %84 = vector.load %arg7[%c0_34, %c0_35, %c0_36] : memref<1x3x128xi32, #tpu.memory_space<vmem>>, vector<1x3x128xi32>
      tpu.vector_store %arg7[%c0_34, %c0_35, %c0_36], %83 {strides = array<i32>} : memref<1x3x128xi32, #tpu.memory_space<vmem>>, vector<1x3x128xi32>,
    } else {
    }
    %c0_17 = arith.constant 0 : index
    %c0_18 = arith.constant 0 : index
    %c0_19 = arith.constant 0 : index
    %69 = vector.load %arg6[%c0_17, %c0_18, %c0_19] : memref<1x3x128xf32, #tpu.memory_space<vmem>>, vector<1x3x128xf32>
    %c0_20 = arith.constant 0 : index
    %c0_21 = arith.constant 0 : index
    %c0_22 = arith.constant 0 : index
    %70 = vector.load %arg7[%c0_20, %c0_21, %c0_22] : memref<1x3x128xi32, #tpu.memory_space<vmem>>, vector<1x3x128xi32>
    %71 = vector.broadcast %55 : vector<1x3x1xf32> to vector<1x3x128xf32>
    %72 = arith.cmpf ogt, %71, %69 : vector<1x3x128xf32>
    %73 = vector.shape_cast %55 : vector<1x3x1xf32> to vector<1x3x1xf32>
    %74 = vector.broadcast %73 : vector<1x3x1xf32> to vector<1x3x128xf32>
    %75 = arith.select %72, %74, %69 : vector<1x3x128xi1>, vector<1x3x128xf32>
    %c0_23 = arith.constant 0 : index
    %c0_24 = arith.constant 0 : index
    %c0_25 = arith.constant 0 : index
    %76 = vector.load %arg6[%c0_23, %c0_24, %c0_25] : memref<1x3x128xf32, #tpu.memory_space<vmem>>, vector<1x3x128xf32>
    tpu.vector_store %arg6[%c0_23, %c0_24, %c0_25], %75 {strides = array<i32>} : memref<1x3x128xf32, #tpu.memory_space<vmem>>, vector<1x3x128xf32>,
    %77 = vector.shape_cast %65 : vector<1x3x1xi32> to vector<1x3x1xi32>
    %78 = vector.broadcast %77 : vector<1x3x1xi32> to vector<1x3x128xi32>
    %79 = arith.select %72, %78, %70 : vector<1x3x128xi1>, vector<1x3x128xi32>
    %c0_26 = arith.constant 0 : index
    %c0_27 = arith.constant 0 : index
    %c0_28 = arith.constant 0 : index
    %80 = vector.load %arg7[%c0_26, %c0_27, %c0_28] : memref<1x3x128xi32, #tpu.memory_space<vmem>>, vector<1x3x128xi32>
    tpu.vector_store %arg7[%c0_26, %c0_27, %c0_28], %79 {strides = array<i32>} : memref<1x3x128xi32, #tpu.memory_space<vmem>>, vector<1x3x128xi32>,
    return
  }
  func.func @transform_0(%arg0: i32, %arg1: i32) -> (i32, i32, i32) {
    %c0_i32 = arith.constant 0 : i32
    %c0_i32_0 = arith.constant 0 : i32
    %c0_i32_1 = arith.constant 0 : i32
    return %arg0, %c0_i32, %c0_i32_0 : i32, i32, i32
  }
  func.func @transform_1(%arg0: i32, %arg1: i32) -> (i32, i32) {
    %c0_i32 = arith.constant 0 : i32
    %c0_i32_0 = arith.constant 0 : i32
    return %c0_i32, %arg1 : i32, i32
  }
  func.func @transform_2(%arg0: i32, %arg1: i32) -> (i32, i32, i32) {
    %c0_i32 = arith.constant 0 : i32
    %c0_i32_0 = arith.constant 0 : i32
    return %arg0, %c0_i32, %arg1 : i32, i32, i32
  }
  func.func @transform_3(%arg0: i32, %arg1: i32) -> (i32, i32, i32) {
    %c0_i32 = arith.constant 0 : i32
    %c0_i32_0 = arith.constant 0 : i32
    return %arg0, %c0_i32, %arg1 : i32, i32, i32
  }
  func.func @transform_4(%arg0: i32, %arg1: i32) -> (i32, i32, i32) {
    %c0_i32 = arith.constant 0 : i32
    %c0_i32_0 = arith.constant 0 : i32
    %c0_i32_1 = arith.constant 0 : i32
    return %arg0, %c0_i32, %c0_i32_0 : i32, i32, i32
  }
  func.func @transform_5(%arg0: i32, %arg1: i32) -> (i32, i32, i32) {
    %c0_i32 = arith.constant 0 : i32
    %c0_i32_0 = arith.constant 0 : i32
    %c0_i32_1 = arith.constant 0 : i32
    return %arg0, %c0_i32, %c0_i32_0 : i32, i32, i32
  }
}

</mosaic_0001>

<bundles_post_ra>
// kernel: tpu_custom_call.1
= control target key start
LH: loop header
LB: loop body
LE: loop exit
PB: predicated region body
PF: predicated region fallthrough
CT: control target
= control target key end

     0   :  { %s1189_s0 = inlined_call_operand.vmem [shape: f32[2,3,4], index: 0, kind: input, shape index: {}]   ;;  %s1190_s1 = inlined_call_operand.hbm [shape: f32[5,256], index: 1, kind: input, shape index: {}]   ;;  %s1191_s2 = inlined_call_operand.hbm [shape: f32[2,1,256], index: 2, kind: output, shape index: {0}]   ;;  %s1192_s3 = inlined_call_operand.hbm [shape: s32[2,1,256], index: 3, kind: output, shape index: {1}]   ;;  %s1193_s4 = inlined_call_operand.vmem [shape: f32[2,3,128], index: 4, kind: output, shape index: {2}]   ;;  %s1194_s5 = inlined_call_operand.vmem [shape: s32[2,3,128], index: 5, kind: output, shape index: {3}]  }
   0x1   :  { %1195 = sst [smem:[#allocation11_spill]] %s1189_s0 }
   0x2   :  { %1196 = sst [smem:[#allocation12_spill]] %s1190_s1 }
   0x3   :  { %11 = vsyncpa [#allocation3], 0 }
   0x4   :  { %12 = vsyncpa [#allocation4], 0 }
   0x5   :  { %14 = vsyncpa [#allocation4 + $0x1], 0 }
   0x6   :  { %15 = vsyncpa [#allocation7], 0 }
   0x7   :  { %17 = vsyncpa [#allocation7 + $0x1], 0  ;;  %s996_s18 = smov 0   ;;  %s998_s19 = smov 0  }
   0x8   :  { %s1000_s20 = smov 0   ;;  %s1002_s21 = smov 0  }
   0x9   :  { %s1004_s22 = smov 0   ;;  %s1006_s23 = smov 0  }
   0xa LB: > { %s707_s24 = sadd.s32 4294967295, %s956_s23   ;;  %s708_s25 = sadd.s32 4294967294, %s956_s23   ;;  %s956_s23 = sphi %s1006_s23, %s23_s23   ;;  %s952_s22 = sphi %s1004_s22, %s1207_s22   ;;  %s948_s21 = sphi %s1002_s21, %s1206_s21   ;;  %s944_s20 = sphi %s1000_s20, %s1205_s20   ;;  %s940_s19 = sphi %s998_s19, %s1204_s19   ;;  %s936_s18 = sphi %s996_s18, %s1203_s18  }
   0xb   : > { %s35_s26 = sadd.s32 1, %s952_s22  ;;  %s96_s27 = sadd.s32 1, %s944_s20 }
   0xc   : > { %p37_p0 = scmp.ge.s32.totalorder %s35_s26, 2  ;;  %p106_p1 = scmp.ne.s32.totalorder %s944_s20, %s940_s19 }
   0xd   : > { %p107_p2 = scmp.eq.s32.totalorder %s707_s24, 1  ;;  %p112_p3 = scmp.ne.s32.totalorder %s940_s19, %s936_s18 }
   0xe   : > { %s1209_s26 = smov (%p37_p0, %s35_s26), 0  ;;  %p113_p5 = scmp.eq.s32.totalorder %s708_s25, 1 }
   0xf   : > { %p1036_p4 = por %p107_p2, %p106_p1  ;;  %s91_s29 = ssub.s32 %s952_s22, %s1209_s26 }
  0x10   : > { %p709_p6 = scmp.ge.s32.totalorder %s956_s23, 1  ;;  %p94_p7 = scmp.eq.s32.totalorder %s91_s29, 0 }
  0x11   : > { %p1043_p8 = por %p113_p5, %p112_p3  ;;  %p200_p9 = scmp.lt.s32.totalorder %s956_s23, 3 }
  0x12   : > { %s1049_s6 = scalar_select %p94_p7, %s944_s20, %s96_s27  }
  0x13   : > { %p201_p10 = pnand %p709_p6, %p200_p9  ;;  %p744_p11 = scmp.eq.s32.totalorder %s707_s24, 0 }
  0x14   : > { %s1199_s1 = sld [smem:[#allocation12_spill]]  ;;  %s958_s10 = smov [#allocation2]  }
  0x15   : > { %p733_p12 = pneg %p201_p10  ;;  %s217_s11 = sshll.u32 %s958_s10, 4  ;;  %s218_s11 = int_to_ptr.vmem [resolvable:$true] %s217_s11 }
  0x17   : > { %p734_p13 = pnand %p744_p11, %p733_p12  ;;  %237 = sbr.rel (%p201_p10) target bundleno = 779 (0x30b), region = 28 }
  0x1a   : > { %s215_s9 = sshll.u32 %s1199_s1, 4  ;;  %s216_s9 = int_to_ptr.hbm [resolvable:$true] %s215_s9 }
  0x1b   : > { %736 = dma.hbm_to_vmem [thread:$0]  (!%p734_p13), %s216_s9, 256, %s218_s11, [#allocation3]  }
  0x1c   : > { %923 = dma.done.wait (%p744_p11), [#allocation3], 256  }
  0x1d   : > { %925 = vsyncadd (%p744_p11), [#allocation3], 4294967040  ;;  %p278_p0 = scmp.lt.s32.totalorder %s948_s21, 1  ;;  %s1200_s0 = sld [smem:[#allocation11_spill]]  ;;  %v960_v1 = vmov 2   ;;  %v961_v2 = vmov 0  }
  0x1e   : > { %s959_s17 = smov 2   ;;  %803 = vset.pattern.permute.xlu1 %v960_v1  ;;  %807 = vset.pattern.permute.xlu0 %v960_v1  ;;  %s962_s29 = smov 127   ;;  %v963_v5 = vmov 3   ;;  %v964_v6 = vmov 1   ;;  %v294_v11 = vld [vmem:[#allocation2] sm:$0x1f] }
  0x1f   : > { %s279_s12 = scalar_select %p278_p0, %s948_s21, 1  ;;  %805 = vset.pattern.permute.xlu2 %v963_v5  ;;  %v295_v12 = vld [vmem:[#allocation2 + $0x8] sm:$0x1f]  ;;  %v301_v13 = vperm.slane %v294_v11, 2  ;;  %v309_v15 = vperm.slane %v294_v11, 0  ;;  %v321_v17 = vperm.slane %v294_v11, 3 }
  0x20   : > { %v302_v14 = vperm.slane %v295_v12, 2  ;;  %v310_v16 = vperm.slane %v295_v12, 0  ;;  %v322_v18 = vperm.slane %v295_v12, 3  ;;  %v329_v19 = vperm.slane %v294_v11, 1  ;;  %s1085_s10 = sand.u32 1, %s940_s19   ;;  %s721_s14 = sshll.u32 %s948_s21, 1 }
  0x21   : > { %s1056_s13 = sshll.u32 %s279_s12, 2  ;;  %v330_v20 = vperm.slane %v295_v12, 1  ;;  %v353_v35 = vperm.slane %v294_v11, 4  ;;  %v354_v36 = vperm.slane %v295_v12, 4  ;;  %v965_v51 = vmov -1.0   ;;  %s714_s11 = sshll.u32 %s1085_s10, 1 }
  0x22   : > { %s1066_s27 = scalar_lea.vmem %s1194_s5, %s1056_s13  ;;  %s1073_s9 = scalar_lea.vmem %s1193_s4, %s1056_s13  ;;  %vm389_vm8 = vcmask 1042432   ;;  %vm433_vm10 = vcmask 1040384  }
  0x23   : > { %s281_s16 = scalar_lea.vmem %s1200_s0, %s1056_s13  ;;  %480 = vst [vmem:[%s1066_s27] sm:$0x7] %v961_v2  ;;  %s1099_s12 = scalar_lea.vmem [#allocation5], %s714_s11 }
  0x24   : > { %v293_v0 = vld [vmem:[%s281_s16] sm:$0x7]  ;;  %479 = vst [vmem:[%s1073_s9] sm:$0x7] %v965_v51  ;;  %s1107_s13 = scalar_lea.vmem [#allocation6], %s714_s11  ;;  %s516_s7 = sshll.u32 %s1099_s12, 4  ;;  %s517_s7 = int_to_ptr.vmem [resolvable:$true] %s516_s7 }
  0x25   : > { %339 = vrot.lane.b32.xlu0 %v293_v0, %s959_s17  ;;  %298 = vperm.xlu1 %803, %v293_v0   ;;  %s514_s17 = scalar_lea.hbm %s1191_s2, %s721_s14  ;;  %s862_s16 = scalar_lea.hbm %s1191_s2, 4 }
  0x26   : > { %318 = vperm.xlu2 %805, %v293_v0   ;;  %s518_s8 = sshll.u32 %s514_s17, 4  ;;  %s519_s8 = int_to_ptr.hbm [resolvable:$true] %s518_s8 }
  0x27   : > { %s856_s11 = sshra.s32 %s519_s8, 4  ;;  %s857_s11 = int_to_ptr.hbm [resolvable:$true] %s856_s11 }
  0x28   : > { %s858_s0 = scalar_lea.hbm %s857_s11, 2  ;;  %p863_p5 = scmp.lt.s32.totalorder %s857_s11, %s1191_s2 }
  0x29   : > { %p859_p1 = scmp.ne.s32.totalorder %s857_s11, %s858_s0  ;;  %p864_p6 = scmp.lt.s32.totalorder %s862_s16, %s858_s0 }
  0x2b   : > { %p860_p2 = pnand %p859_p1, %p1036_p4  ;;  %p865_p7 = por %p864_p6, %p863_p5 }
  0x2d   : > { %804 = vset.pattern.permute.xlu1 %v961_v2  ;;  %p861_p3 = pneg %p860_p2 }
  0x2e   : > { %306 = vperm.xlu1 %804, %v293_v0   ;;  %806 = vset.pattern.permute.xlu2 %v964_v6 }
  0x2f   : > { %326 = vperm.xlu2 %806, %v293_v0   ;;  %p866_p9 = pnand %p865_p7, %p861_p3 }
  0x80   : > { %v319_v10 = vpop.permute.xlu2 %318 }
  0x81   : > { %v323_v27 = vmin.f32 %v319_v10, %v321_v17  ;;  %v324_v28 = vmin.f32 %v319_v10, %v322_v18 }
  0x89   : > { %v327_v22 = vpop.permute.xlu2 %326 }
  0x8a   : > { %v331_v29 = vmax.f32 %v327_v22, %v329_v19  ;;  %v332_v30 = vmax.f32 %v327_v22, %v330_v20 }
  0x8c   : > { %v333_v31 = vsub.f32 %v323_v27, %v331_v29  ;;  %v334_v32 = vsub.f32 %v324_v28, %v332_v30 }
  0x8e   : > { %v335_v37 = vmax.f32 %v333_v31, 0.0  ;;  %v336_v38 = vmax.f32 %v334_v32, 0.0 }
  0x97   : > { %v340_v3 = vpop.permute.xlu0 %339  ;;  %v299_v9 = vpop.permute.xlu1 %298 }
  0x98   : > { %v342_v4 = vsub.f32 %v293_v0, %v340_v3  ;;  %v303_v23 = vmin.f32 %v299_v9, %v301_v13  ;;  %v304_v24 = vmin.f32 %v299_v9, %v302_v14 }
  0x9a   : > { %344 = vrot.lane.b32.xlu0 %v342_v4, %s962_s29  ;;  %s530_s29 = scalar_lea.hbm %s1192_s3, %s721_s14 }
  0xa0   : > { %v307_v21 = vpop.permute.xlu1 %306 }
  0xa1   : > { %v311_v25 = vmax.f32 %v307_v21, %v309_v15  ;;  %v312_v26 = vmax.f32 %v307_v21, %v310_v16  ;;  %v404_v16 = vlaneseq }
  0xa3   : > { %v313_v33 = vsub.f32 %v303_v23, %v311_v25  ;;  %v314_v34 = vsub.f32 %v304_v24, %v312_v26  ;;  %v405_v21 = vshrl.u32 %v404_v16, 7  ;;  %vm1090_vm12 = vcmp.lt.s32.totalorder %v404_v16, 256 }
  0xa5   : > { %v315_v39 = vmax.f32 %v313_v33, 0.0  ;;  %v316_v40 = vmax.f32 %v314_v34, 0.0 }
  0xa7   : > { %v337_v42 = vmul.f32 %v335_v37, %v315_v39  ;;  %v338_v43 = vmul.f32 %v336_v38, %v316_v40 }
 0x10c   : > { %v345_v7 = vpop.permute.xlu0 %344 }
 0x10d   : > { %v347_v8 = vmul.f32 %v345_v7, %v342_v4 }
 0x10f   : > { %350 = vperm.xlu0 %807, %v347_v8  }
 0x181   : > { %v351_v41 = vpop.permute.xlu0 %350 }
 0x182   : > { %v355_v44 = vadd.f32 %v353_v35, %v351_v41  ;;  %v356_v45 = vadd.f32 %v354_v36, %v351_v41 }
 0x184   : > { %v357_v46 = vsub.f32 %v355_v44, %v337_v42  ;;  %v358_v47 = vsub.f32 %v356_v45, %v338_v43  ;;  %v448_v45 = vand.u32 127, %v404_v16 }
 0x186   : > { %808 = vrcp.f32 %v357_v46  ;;  %v370_v54 = vand.u32 2147483648, %v357_v46  ;;  %v368_v57 = vand.u32 2147483647, %v357_v46  ;;  %v385_v58 = vand.u32 2147483648, %v358_v47 }
 0x187   : > { %810 = vrcp.f32 %v358_v47  ;;  %v383_v60 = vand.u32 2147483647, %v358_v47  ;;  %vm364_vm2 = vweird.f32 %v357_v46  ;;  %vm379_vm4 = vweird.f32 %v358_v47 }
 0x188   : > { %v371_v62 = vor.u32 1.1754944e-38, %v370_v54  ;;  %vm369_vm5 = vcmp.eq.f32.partialorder %v368_v57, 8.507059e+37  ;;  %v386_v1 = vor.u32 1.1754944e-38, %v385_v58 }
 0x189   : > { %vm384_vm7 = vcmp.eq.f32.partialorder %v383_v60, 8.507059e+37 }
 0x18c   : > { %v809_v48 = vpop.eup %808 }
 0x18d   : > { %v811_v49 = vpop.eup %810  ;;  %v360_v50 = vmul.f32 %v809_v48, %v357_v46  ;;  %vm365_vm0 = vweird.f32 %v809_v48  ;;  %v449_v46 = vadd.s32 128, %v448_v45 }
 0x18e   : > { %v375_v52 = vmul.f32 %v811_v49, %v358_v47  ;;  %vm380_vm1 = vweird.f32 %v811_v49  ;;  %vm366_vm3 = vmor %vm364_vm2, %vm365_vm0  ;;  %v1113_v47 = vld [vmem:[%s1073_s9] sm:$0x7] }
 0x18f   : > { %v361_v53 = vsub.f32 1.0, %v360_v50  ;;  %vm381_vm6 = vmor %vm379_vm4, %vm380_vm1 }
 0x190   : > { %v376_v55 = vsub.f32 1.0, %v375_v52 }
 0x191   : > { %v362_v56 = vmul.f32 %v809_v48, %v361_v53 }
 0x192   : > { %v377_v59 = vmul.f32 %v811_v49, %v376_v55 }
 0x193   : > { %v363_v61 = vadd.f32 %v809_v48, %v362_v56 }
 0x194   : > { %v378_v63 = vadd.f32 %v811_v49, %v377_v59 }
 0x195   : > { %v367_v0 = vsel %vm366_vm3, %v809_v48, %v363_v61 }
 0x196   : > { %v372_v2 = vsel %vm369_vm5, %v371_v62, %v367_v0  ;;  %v382_v3 = vsel %vm381_vm6, %v811_v49, %v378_v63 }
 0x197   : > { %v1076_v4 = vmul.f32 %v372_v2, %v337_v42  ;;  %v387_v5 = vsel %vm384_vm7, %v386_v1, %v382_v3 }
 0x198   : > { %v1078_v6 = vmul.f32 %v387_v5, %v338_v43 }
 0x199   : > { %v390_v7 = vsel %vm389_vm8, %v1076_v4, -inf }
 0x19a   : > { %v397_v8 = vsel %vm389_vm8, %v1078_v6, -inf  ;;  %v391_v9 = vrot.slane %v390_v7, 4 }
 0x19b   : > { %v398_v10 = vrot.slane %v397_v8, 4  ;;  %v444_v11 = vmax.f32 %v390_v7, %v397_v8 }
 0x19c   : > { %v392_v12 = vmax.f32 %v390_v7, %v391_v9 }
 0x19d   : > { %v399_v13 = vmax.f32 %v397_v8, %v398_v10  ;;  %445 = vmax.xlane.f32.xlu1 %v444_v11 }
 0x19e   : > { %v393_v14 = vrot.slane %v392_v12, 2 }
 0x19f   : > { %v400_v15 = vrot.slane %v399_v13, 2 }
 0x1a0   : > { %v394_v17 = vmax.f32 %v392_v12, %v393_v14 }
 0x1a1   : > { %v401_v18 = vmax.f32 %v399_v13, %v400_v15 }
 0x1a2   : > { %v395_v19 = vrot.slane %v394_v17, 1 }
 0x1a3   : > { %v402_v20 = vrot.slane %v401_v18, 1 }
 0x1a4   : > { %v396_v22 = vmax.f32 %v394_v17, %v395_v19 }
 0x1a5   : > { %v403_v23 = vmax.f32 %v401_v18, %v402_v20 }
 0x1a6   : > { %vm406_vm9 = vcmp.eq.f32.partialorder %v1076_v4, %v396_v22 }
 0x1a7   : > { %vm407_vm11 = vcmp.eq.f32.partialorder %v1078_v6, %v403_v23  ;;  %v432_v24 = vrot.slane %v403_v23, 7  ;;  %v408_v25 = vsel %vm406_vm9, %v405_v21, 1073741824 }
 0x1a8   : > { %v409_v27 = vsel %vm407_vm11, %v405_v21, 1073741824  ;;  %v410_v28 = vsel %vm389_vm8, %v408_v25, 2147483647 }
 0x1a9   : > { %v420_v29 = vsel %vm389_vm8, %v409_v27, 2147483647  ;;  %v434_v30 = vsel %vm433_vm10, %v396_v22, %v432_v24  ;;  %v411_v31 = vrot.slane %v410_v28, 4 }
 0x1aa   : > { %v421_v32 = vrot.slane %v420_v29, 4  ;;  %440 = vst.msk [vmem:[%s1099_s12] sm:$0x3] %vm1090_vm12, %v434_v30 }
 0x1ab   : > { %vm412_vm13 = vcmp.lt.s32.totalorder %v410_v28, %v411_v31 }
 0x1ac   : > { %vm422_vm14 = vcmp.lt.s32.totalorder %v420_v29, %v421_v32  ;;  %v413_v33 = vsel %vm412_vm13, %v410_v28, %v411_v31 }
 0x1ad   : > { %v414_v34 = vrot.slane %v413_v33, 2  ;;  %v423_v35 = vsel %vm422_vm14, %v420_v29, %v421_v32 }
 0x1ae   : > { %v424_v36 = vrot.slane %v423_v35, 2 }
 0x1af   : > { %vm415_vm15 = vcmp.lt.s32.totalorder %v413_v33, %v414_v34 }
 0x1b0   : > { %v416_v37 = vsel %vm415_vm15, %v413_v33, %v414_v34  ;;  %vm425_vm0 = vcmp.lt.s32.totalorder %v423_v35, %v424_v36 }
 0x1b1   : > { %v417_v38 = vrot.slane %v416_v37, 1  ;;  %v426_v39 = vsel %vm425_vm0, %v423_v35, %v424_v36 }
 0x1b2   : > { %v427_v40 = vrot.slane %v426_v39, 1 }
 0x1b3   : > { %vm418_vm1 = vcmp.lt.s32.totalorder %v416_v37, %v417_v38 }
 0x1b4   : > { %vm428_vm2 = vcmp.lt.s32.totalorder %v426_v39, %v427_v40  ;;  %v419_v43 = vsel %vm418_vm1, %v416_v37, %v417_v38 }
 0x1b5   : > { %v429_v41 = vsel %vm428_vm2, %v426_v39, %v427_v40 }
 0x1b6   : > { %v441_v42 = vrot.slane %v429_v41, 7 }
 0x1b8   : > { %v442_v44 = vsel %vm433_vm10, %v419_v43, %v441_v42 }
 0x1b9   : > { %443 = vst.msk [vmem:[%s1107_s13] sm:$0x3] %vm1090_vm12, %v442_v44 }
 0x210   : > { %v1115_v48 = vpop.xlane.xlu1 %445 }
 0x211   : > { %vm450_vm3 = vcmp.eq.f32.partialorder %v1076_v4, %v1115_v48  ;;  %vm451_vm4 = vcmp.eq.f32.partialorder %v1078_v6, %v1115_v48  ;;  %vm483_vm5 = vcmp.gt.f32.partialorder %v1115_v48, %v1113_v47 }
 0x212   : > { %v452_v49 = vsel %vm450_vm3, %v448_v45, 1073741824  ;;  %v453_v50 = vsel %vm451_vm4, %v449_v46, 1073741824  ;;  %v484_v51 = vsel %vm483_vm5, %v1115_v48, %v1113_v47 }
 0x213   : > { %485 = vst [vmem:[%s1073_s9] sm:$0x7] %v484_v51  ;;  %v454_v52 = vsel %vm389_vm8, %v452_v49, 2147483647  ;;  %v455_v53 = vsel %vm389_vm8, %v453_v50, 2147483647  ;;  %s489_s9 = scalar_lea.sflag [#allocation4], %s1085_s10 }
 0x214   : > { %vm456_vm6 = vcmp.lt.s32.totalorder %v454_v52, %v455_v53 }
 0x215   : > { %v457_v54 = vsel %vm456_vm6, %v454_v52, %v455_v53 }
 0x216   : > { %v459_v55 = vshra.s32 %v457_v54, 16  ;;  %v458_v57 = vand.u32 65535, %v457_v54 }
 0x218   : > { %v461_v56 = vcvt.s32.f32 %v459_v55 }
 0x21a   : > { %462 = vmin.xlane.f32.xlu2 %v461_v56 }
 0x21b   : > { %869 = shalt.err (!%p866_p9)
}
 0x21c   : > { %729 = dma.vmem_to_hbm [thread:$0]  (%p1036_p4), %s517_s7, 32, %s519_s8, %s489_s9   ;;  %v460_v59 = vcvt.s32.f32 %v458_v57 }
 0x21d   : > { %s532_s12 = sshll.u32 %s1107_s13, 4  ;;  %s534_s14 = sshll.u32 %s530_s29, 4  ;;  %s533_s12 = int_to_ptr.vmem [resolvable:$true] %s532_s12  ;;  %s535_s14 = int_to_ptr.hbm [resolvable:$true] %s534_s14 }
 0x21e   : > { %s494_s17 = scalar_lea.sflag [#allocation7], %s1085_s10  ;;  %s884_s25 = sshra.s32 %s535_s14, 4  ;;  %s885_s25 = int_to_ptr.hbm [resolvable:$true] %s884_s25 }
 0x21f   : > { %s886_s1 = scalar_lea.hbm %s885_s25, 2  ;;  %s890_s21 = scalar_lea.hbm %s1192_s3, 4 }
 0x220   : > { %p887_p10 = scmp.ne.s32.totalorder %s885_s25, %s886_s1  ;;  %p891_p13 = scmp.lt.s32.totalorder %s885_s25, %s1192_s3 }
 0x221   : > { %p892_p0 = scmp.lt.s32.totalorder %s890_s21, %s886_s1 }
 0x222   : > { %p888_p11 = pnand %p887_p10, %p1036_p4 }
 0x223   : > { %p893_p1 = por %p892_p0, %p891_p13 }
 0x224   : > { %p889_p12 = pneg %p888_p11 }
 0x226   : > { %p894_p2 = pnand %p893_p1, %p889_p12 }
 0x28d   : > { %v463_v58 = vpop.xlane.xlu2 %462 }
 0x28e   : > { %897 = shalt.err (!%p894_p2)
}
 0x28f   : > { %730 = dma.vmem_to_hbm [thread:$0]  (%p1036_p4), %s533_s12, 32, %s535_s14, %s494_s17   ;;  %vm464_vm7 = vcmp.eq.f32.partialorder %v461_v56, %v463_v58  ;;  %v469_v61 = vcvt.f32.s32 %v463_v58  ;;  %v482_v1 = vld [vmem:[%s1066_s27] sm:$0x7] }
 0x290   : > { %v465_v60 = vsel %vm464_vm7, %v460_v59, inf }
 0x291   : > { %466 = vmin.xlane.f32.xlu0 %v465_v60  ;;  %v470_v63 = vshll.u32 %v469_v61, 16 }
 0x304   : > { %v467_v62 = vpop.xlane.xlu0 %466 }
 0x305   : > { %v468_v0 = vcvt.f32.s32 %v467_v62 }
 0x307   : > { %v471_v2 = vadd.s32 %v470_v63, %v468_v0 }
 0x309   : > { %v486_v3 = vsel %vm483_vm5, %v471_v2, %v482_v1 }
 0x30a   : > { %487 = vst [vmem:[%s1066_s27] sm:$0x7] %v486_v3 }
 0x30b PF: > { %p746_p3 = scmp.ge.s32.totalorder %s956_s23, 2  ;;  %s552_s28 = sand.u32 1, %s936_s18  }
 0x30c   : > { %s553_s10 = scalar_lea.sflag [#allocation4], %s552_s28 }
 0x30d   : > { %p738_p4 = pnand %p746_p3, %p1043_p8 }
 0x30f   : > { %p739_p5 = pneg %p738_p4 }
 0x311   : > { %927 = dma.done.wait (%p739_p5), %s553_s10, 32  }
 0x312   : > { %929 = vsyncadd (%p739_p5), %s553_s10, 4294967264  ;;  %s563_s13 = scalar_lea.sflag [#allocation7], %s552_s28 }
 0x313   : > { %931 = dma.done.wait (%p739_p5), %s563_s13, 32  }
 0x314   : > { %933 = vsyncadd (%p739_p5), %s563_s13, 4294967264  ;;  %s23_s23 = sadd.s32 1, %s956_s23   ;;  %s1203_s18 = smov %s940_s19 }
 0x315   : > { %p20_p6 = scmp.ge.s32.totalorder %s23_s23, 4   ;;  %s1204_s19 = smov %s944_s20 }
 0x316   : > { %s1205_s20 = smov %s1049_s6  ;;  %s1206_s21 = smov %s952_s22 }
 0x317   : > { %s1207_s22 = smov %s1209_s26  ;;  %22 = sbr.rel (!%p20_p6) target bundleno = 10 (0xa), region = 114 }
 0x31c   :  { %583 = vsyncpa [#allocation3], 1 }
 0x31d   :  { %585 = vsyncpa [#allocation3 + $0x1], 1 }
 0x31e   :  { %586 = vsyncpa [#allocation4], 1 }
 0x31f   :  { %588 = vsyncpa [#allocation4 + $0x1], 1 }
 0x320   :  { %589 = vsyncpa [#allocation7], 1 }
 0x321   :  { %591 = vsyncpa [#allocation7 + $0x1], 1 }

</bundles_post_ra>
